<compile_context>
chip_gen: v5e
topology: v5e:2x2
jax: 0.10.0
libtpu: 0.0.40
codegen_flags: <defaults>
</compile_context>

<pallas_src>
import functools

import jax
import jax.numpy as jnp
from jax.experimental import pallas as pl
from jax.experimental.pallas import tpu as pltpu


def _round_up(x, m):
    return (x + m - 1) // m * m


def _pick_vmem_limit():
    """Per-generation scoped-VMEM limit: ~3/4 of physical (48 MiB v7x, 96 MiB v5e/v6e)."""
    cap = 128 * 1024 * 1024
    try:
        cap = int(pltpu.get_tpu_info().vmem_capacity_bytes)
    except Exception:
        pass
    return max(32 * 1024 * 1024, min(96 * 1024 * 1024, (cap * 3) // 4))


_VMEM_LIMIT = _pick_vmem_limit()
_INTERMEDIATE_DTYPE = jnp.bfloat16   # conv output: written once / read once -> bf16


# ----------------------------------------------------------------------------
# Kernel 1: per-pixel local 3x3 conv (one (batch, channel) slab per grid step)
#           + per-channel BN partial statistics.
#   x_ref  : (H, W)      activation slab (native NCHW layout, no wrapper pad)
#   w_ref  : (9, H, W)   the 9 per-pixel taps of this channel (native layout/dtype)
#   y_ref  : (H, W)      conv output (bf16)
#   s1/s2  : (1, 1)      sum / sum-of-squares over (H, W) (finished over B outside)
#   xp_ref : (H+2, W+2)  VMEM halo scratch (zero padding folded into the kernel)
# ----------------------------------------------------------------------------
def _local_conv_kernel(x_ref, w_ref, y_ref, s1_ref, s2_ref, xp_ref, *, H, W):
    # Build the zero-padded slab in VMEM (no HBM pad pass in the wrapper).
    xp_ref[...] = jnp.zeros_like(xp_ref)
    xp_ref[1:H + 1, 1:W + 1] = x_ref[...].astype(jnp.float32)

    # 9 statically-shifted taps; accumulate in f32 registers.
    # (The shifts could also be expressed with pltpu.roll if the static slices ever
    #  show up as materialized VMEM copies in the bundle dump.)
    acc = xp_ref[0:H, 0:W] * w_ref[0].astype(jnp.float32)
    for k in range(1, 9):
        i, j = divmod(k, 3)
        acc = acc + xp_ref[i:i + H, j:j + W] * w_ref[k].astype(jnp.float32)

    y_ref[...] = acc.astype(y_ref.dtype)

    # Partial BN statistics -> avoids re-reading y from HBM for the stats pass.
    row1 = jnp.sum(acc, axis=1, keepdims=True)           # (H, 1)
    row2 = jnp.sum(acc * acc, axis=1, keepdims=True)     # (H, 1)
    s1_ref[...] = jnp.sum(row1, axis=0, keepdims=True)   # (1, 1)
    s2_ref[...] = jnp.sum(row2, axis=0, keepdims=True)   # (1, 1)


def _local_conv_with_stats(x, weight, out_dtype):
    B, C, H, W = x.shape
    assert weight.shape == (B, 9 * C, H, W)
    kernel = functools.partial(_local_conv_kernel, H=H, W=W)
    return pl.pallas_call(
        kernel,
        out_shape=(jax.ShapeDtypeStruct((B, C, H, W), out_dtype),
                   jax.ShapeDtypeStruct((B, C, 1, 1), jnp.float32),
                   jax.ShapeDtypeStruct((B, C, 1, 1), jnp.float32)),
        grid=(B, C),
        in_specs=[
            # activation: one (H, W) channel slab, native NCHW, native dtype
            pl.BlockSpec((None, None, H, W), lambda b, c: (b, c, 0, 0)),
            # weight: the contiguous 9-tap block of channel c from (B, 9*C, H, W)
            pl.BlockSpec((None, 9, H, W), lambda b, c: (b, c, 0, 0)),
        ],
        out_specs=(
            pl.BlockSpec((None, None, H, W), lambda b, c: (b, c, 0, 0)),
            pl.BlockSpec((None, None, 1, 1), lambda b, c: (b, c, 0, 0)),
            pl.BlockSpec((None, None, 1, 1), lambda b, c: (b, c, 0, 0)),
        ),
        scratch_shapes=[pltpu.VMEM((H + 2, W + 2), jnp.float32)],
        compiler_params=pltpu.CompilerParams(
            dimension_semantics=("parallel", "parallel"),
            vmem_limit_bytes=_VMEM_LIMIT),
    )(x, weight)


# ----------------------------------------------------------------------------
# Kernel 2: fused BN affine (per-row scale/shift) + ReLU on a lane-dense
#           (B*C, H*W) slab.
# ----------------------------------------------------------------------------
def _affine_relu_kernel(x_ref, s_ref, b_ref, o_ref):
    xv = x_ref[...].astype(jnp.float32)
    o_ref[...] = jnp.maximum(xv * s_ref[...] + b_ref[...], 0.0).astype(o_ref.dtype)


def _affine_relu(y2d, scale_col, shift_col, out_dtype):
    M, N = y2d.shape

    # Lane tile: keep the last dim 128-dense (or equal to the full array dim).
    tn = min(N, 4096) if N % 128 == 0 else N
    # Row tile from a VMEM budget (double-buffered in + out), multiple of 8 sublanes.
    bytes_per_row = 2 * tn * (y2d.dtype.itemsize + jnp.dtype(out_dtype).itemsize)
    budget = _VMEM_LIMIT // 2
    tm = min(1024, max(8, (budget // bytes_per_row) // 8 * 8))
    tm = min(tm, _round_up(M, 8))
    # Give megacore parts (v7x) at least 2 parallel steps when it is cheap to do so.
    if pl.cdiv(M, tm) * pl.cdiv(N, tn) < 2 and tn % 256 == 0:
        tn //= 2

    Mp = _round_up(M, 8)
    if Mp != M:   # not hit for the shipped shapes; keeps the (8, x) tiling legal
        y2d = jnp.pad(y2d, ((0, Mp - M), (0, 0)))
        scale_col = jnp.pad(scale_col, ((0, Mp - M), (0, 0)))
        shift_col = jnp.pad(shift_col, ((0, Mp - M), (0, 0)))

    out = pl.pallas_call(
        _affine_relu_kernel,
        out_shape=jax.ShapeDtypeStruct((Mp, N), out_dtype),
        grid=(pl.cdiv(Mp, tm), pl.cdiv(N, tn)),
        in_specs=[pl.BlockSpec((tm, tn), lambda i, j: (i, j)),
                  pl.BlockSpec((tm, 1), lambda i, j: (i, 0)),
                  pl.BlockSpec((tm, 1), lambda i, j: (i, 0))],
        out_specs=pl.BlockSpec((tm, tn), lambda i, j: (i, j)),
        compiler_params=pltpu.CompilerParams(
            dimension_semantics=("parallel", "parallel"),
            vmem_limit_bytes=_VMEM_LIMIT),
    )(y2d, scale_col, shift_col)
    return out[:M]


# ----------------------------------------------------------------------------
# Basic2dLocal.forward
# ----------------------------------------------------------------------------
@jax.jit
def basic2d_local_forward(gamma, beta, x, weight, eps=1e-5):
    """x: (B, C, H, W); weight: (B, 9*C, H, W); gamma/beta: (C,). Returns (B, C, H, W)."""
    B, C, H, W = x.shape

    # Pass 1: local conv + fused per-channel partial BN stats.  x and weight are
    # read straight from their native layouts (no wrapper relayout / cast / pad).
    y, s1, s2 = _local_conv_with_stats(x, weight, _INTERMEDIATE_DTYPE)

    # BatchNorm2d training mode: biased batch statistics over (B, H, W).
    cnt = float(B * H * W)
    sum_c = jnp.sum(s1.reshape(B, C), axis=0)
    sq_c = jnp.sum(s2.reshape(B, C), axis=0)
    mean = sum_c / cnt
    var = jnp.maximum(sq_c / cnt - mean * mean, 0.0)
    scale = gamma.astype(jnp.float32) * jax.lax.rsqrt(var + eps)
    shift = beta.astype(jnp.float32) - mean * scale

    # Pass 2: fused scale/shift + ReLU on a lane-dense (B*C, H*W) slab (pure
    # reshapes, no transposes; per-channel scale/shift become per-row columns).
    scale_col = jnp.tile(scale, (B,)).reshape(B * C, 1)
    shift_col = jnp.tile(shift, (B,)).reshape(B * C, 1)
    out2d = _affine_relu(y.reshape(B * C, H * W), scale_col, shift_col, x.dtype)
    return out2d.reshape(B, C, H, W)


# ----------------------------------------------------------------------------
# Pure-JAX reference (same semantics) for validation
# ----------------------------------------------------------------------------
def _reference(gamma, beta, x, weight, eps=1e-5):
    B, C, H, W = x.shape
    wr = weight.reshape(B, C, 9, H, W)
    xpad = jnp.pad(x, ((0, 0), (0, 0), (1, 1), (1, 1)))
    out = jnp.zeros_like(x)
    for k in range(9):
        i, j = divmod(k, 3)
        out = out + xpad[:, :, i:i + H, j:j + W] * wr[:, :, k]
    mean = jnp.mean(out, axis=(0, 2, 3), keepdims=True)
    var = jnp.var(out, axis=(0, 2, 3), keepdims=True)
    y = (out - mean) / jnp.sqrt(var + eps)
    y = y * gamma[None, :, None, None] + beta[None, :, None, None]
    return jnp.maximum(y, 0.0)


# ----------------------------------------------------------------------------
if __name__ == "__main__":
    B, C, H, W = 2, 4, 16, 16
    key = jax.random.PRNGKey(0)
    kx, kw, kg, kb = jax.random.split(key, 4)

    x = jax.random.normal(kx, (B, C, H, W), jnp.float32)
    weight = 0.1 * jax.random.normal(kw, (B, 9 * C, H, W), jnp.float32)
    # BatchNorm2d affine params (perturbed from the 1/0 defaults for a stronger check)
    gamma = 1.0 + 0.1 * jax.random.normal(kg, (C,), jnp.float32)
    beta = 0.1 * jax.random.normal(kb, (C,), jnp.float32)

    out = basic2d_local_forward(gamma, beta, x, weight)
    out = jax.block_until_ready(out)

    ref = _reference(gamma, beta, x, weight)
    assert out.shape == (B, C, H, W)
    assert bool(jnp.all(jnp.isfinite(out)))
    # The conv intermediate is stored in bf16 (BN stats stay f32), so compare with a
    # correspondingly loose tolerance against the all-f32 reference.
    assert bool(jnp.allclose(out, ref, atol=5e-2, rtol=5e-2))
    print("KERNEL_OK")
</pallas_src>

<mosaic_0001>
module attributes {stable_mosaic.version = 11 : i64} {
  func.func @_local_conv_kernel(%arg0: i32, %arg1: i32, %arg2: memref<1x1x16x16xf32, #tpu.memory_space<vmem>>, %arg3: memref<1x9x16x16xf32, #tpu.memory_space<vmem>>, %arg4: memref<1x1x16x16xbf16, #tpu.memory_space<vmem>>, %arg5: memref<1x1x1x1xf32, #tpu.memory_space<vmem>>, %arg6: memref<1x1x1x1xf32, #tpu.memory_space<vmem>>, %arg7: memref<18x18xf32, #tpu.memory_space<vmem>>) attributes {dimension_semantics = [#tpu.dimension_semantics<parallel>, #tpu.dimension_semantics<parallel>], iteration_bounds = array<i64: 2, 4>, scalar_prefetch = 0 : i64, scratch_operands = 1 : i64, tpu.core_type = #tpu.core_type<tc>, window_params = [{transform_indices = @transform_0, window_bounds = array<i64: 1, 1, 16, 16>}, {transform_indices = @transform_1, window_bounds = array<i64: 1, 9, 16, 16>}, {transform_indices = @transform_2, window_bounds = array<i64: 1, 1, 16, 16>}, {transform_indices = @transform_3, window_bounds = array<i64: 1, 1, 1, 1>}, {transform_indices = @transform_4, window_bounds = array<i64: 1, 1, 1, 1>}]} {
    %cst = arith.constant 0.000000e+00 : f32
    %0 = vector.broadcast %cst : f32 to vector<18x18xf32>
    %c0 = arith.constant 0 : index
    %c0_0 = arith.constant 0 : index
    %1 = vector.load %arg7[%c0, %c0_0] : memref<18x18xf32, #tpu.memory_space<vmem>>, vector<18x18xf32>
    tpu.vector_store %arg7[%c0, %c0_0], %0 {strides = array<i32>} : memref<18x18xf32, #tpu.memory_space<vmem>>, vector<18x18xf32>,
    %c0_1 = arith.constant 0 : index
    %c0_2 = arith.constant 0 : index
    %c0_3 = arith.constant 0 : index
    %c0_4 = arith.constant 0 : index
    %2 = vector.load %arg2[%c0_1, %c0_2, %c0_3, %c0_4] : memref<1x1x16x16xf32, #tpu.memory_space<vmem>>, vector<1x1x16x16xf32>
    %3 = vector.shape_cast %2 : vector<1x1x16x16xf32> to vector<16x16xf32>
    %c1 = arith.constant 1 : index
    %c1_5 = arith.constant 1 : index
    %4 = vector.load %arg7[%c1, %c1_5] : memref<18x18xf32, #tpu.memory_space<vmem>>, vector<16x16xf32>
    tpu.vector_store %arg7[%c1, %c1_5], %3 {strides = array<i32>} : memref<18x18xf32, #tpu.memory_space<vmem>>, vector<16x16xf32>,
    %c0_6 = arith.constant 0 : index
    %c0_7 = arith.constant 0 : index
    %5 = vector.load %arg7[%c0_6, %c0_7] : memref<18x18xf32, #tpu.memory_space<vmem>>, vector<16x16xf32>
    %c0_8 = arith.constant 0 : index
    %c0_9 = arith.constant 0 : index
    %c0_10 = arith.constant 0 : index
    %c0_11 = arith.constant 0 : index
    %6 = vector.load %arg3[%c0_8, %c0_9, %c0_10, %c0_11] : memref<1x9x16x16xf32, #tpu.memory_space<vmem>>, vector<1x1x16x16xf32>
    %7 = vector.shape_cast %6 : vector<1x1x16x16xf32> to vector<16x16xf32>
    %8 = arith.mulf %5, %7 : vector<16x16xf32>
    %c0_12 = arith.constant 0 : index
    %c1_13 = arith.constant 1 : index
    %9 = vector.load %arg7[%c0_12, %c1_13] : memref<18x18xf32, #tpu.memory_space<vmem>>, vector<16x16xf32>
    %c0_14 = arith.constant 0 : index
    %c1_15 = arith.constant 1 : index
    %c0_16 = arith.constant 0 : index
    %c0_17 = arith.constant 0 : index
    %10 = vector.load %arg3[%c0_14, %c1_15, %c0_16, %c0_17] : memref<1x9x16x16xf32, #tpu.memory_space<vmem>>, vector<1x1x16x16xf32>
    %11 = vector.shape_cast %10 : vector<1x1x16x16xf32> to vector<16x16xf32>
    %12 = arith.mulf %9, %11 : vector<16x16xf32>
    %13 = arith.addf %8, %12 : vector<16x16xf32>
    %c0_18 = arith.constant 0 : index
    %c2 = arith.constant 2 : index
    %14 = vector.load %arg7[%c0_18, %c2] : memref<18x18xf32, #tpu.memory_space<vmem>>, vector<16x16xf32>
    %c0_19 = arith.constant 0 : index
    %c2_20 = arith.constant 2 : index
    %c0_21 = arith.constant 0 : index
    %c0_22 = arith.constant 0 : index
    %15 = vector.load %arg3[%c0_19, %c2_20, %c0_21, %c0_22] : memref<1x9x16x16xf32, #tpu.memory_space<vmem>>, vector<1x1x16x16xf32>
    %16 = vector.shape_cast %15 : vector<1x1x16x16xf32> to vector<16x16xf32>
    %17 = arith.mulf %14, %16 : vector<16x16xf32>
    %18 = arith.addf %13, %17 : vector<16x16xf32>
    %c1_23 = arith.constant 1 : index
    %c0_24 = arith.constant 0 : index
    %19 = vector.load %arg7[%c1_23, %c0_24] : memref<18x18xf32, #tpu.memory_space<vmem>>, vector<16x16xf32>
    %c0_25 = arith.constant 0 : index
    %c3 = arith.constant 3 : index
    %c0_26 = arith.constant 0 : index
    %c0_27 = arith.constant 0 : index
    %20 = vector.load %arg3[%c0_25, %c3, %c0_26, %c0_27] : memref<1x9x16x16xf32, #tpu.memory_space<vmem>>, vector<1x1x16x16xf32>
    %21 = vector.shape_cast %20 : vector<1x1x16x16xf32> to vector<16x16xf32>
    %22 = arith.mulf %19, %21 : vector<16x16xf32>
    %23 = arith.addf %18, %22 : vector<16x16xf32>
    %c1_28 = arith.constant 1 : index
    %c1_29 = arith.constant 1 : index
    %24 = vector.load %arg7[%c1_28, %c1_29] : memref<18x18xf32, #tpu.memory_space<vmem>>, vector<16x16xf32>
    %c0_30 = arith.constant 0 : index
    %c4 = arith.constant 4 : index
    %c0_31 = arith.constant 0 : index
    %c0_32 = arith.constant 0 : index
    %25 = vector.load %arg3[%c0_30, %c4, %c0_31, %c0_32] : memref<1x9x16x16xf32, #tpu.memory_space<vmem>>, vector<1x1x16x16xf32>
    %26 = vector.shape_cast %25 : vector<1x1x16x16xf32> to vector<16x16xf32>
    %27 = arith.mulf %24, %26 : vector<16x16xf32>
    %28 = arith.addf %23, %27 : vector<16x16xf32>
    %c1_33 = arith.constant 1 : index
    %c2_34 = arith.constant 2 : index
    %29 = vector.load %arg7[%c1_33, %c2_34] : memref<18x18xf32, #tpu.memory_space<vmem>>, vector<16x16xf32>
    %c0_35 = arith.constant 0 : index
    %c5 = arith.constant 5 : index
    %c0_36 = arith.constant 0 : index
    %c0_37 = arith.constant 0 : index
    %30 = vector.load %arg3[%c0_35, %c5, %c0_36, %c0_37] : memref<1x9x16x16xf32, #tpu.memory_space<vmem>>, vector<1x1x16x16xf32>
    %31 = vector.shape_cast %30 : vector<1x1x16x16xf32> to vector<16x16xf32>
    %32 = arith.mulf %29, %31 : vector<16x16xf32>
    %33 = arith.addf %28, %32 : vector<16x16xf32>
    %c2_38 = arith.constant 2 : index
    %c0_39 = arith.constant 0 : index
    %34 = vector.load %arg7[%c2_38, %c0_39] : memref<18x18xf32, #tpu.memory_space<vmem>>, vector<16x16xf32>
    %c0_40 = arith.constant 0 : index
    %c6 = arith.constant 6 : index
    %c0_41 = arith.constant 0 : index
    %c0_42 = arith.constant 0 : index
    %35 = vector.load %arg3[%c0_40, %c6, %c0_41, %c0_42] : memref<1x9x16x16xf32, #tpu.memory_space<vmem>>, vector<1x1x16x16xf32>
    %36 = vector.shape_cast %35 : vector<1x1x16x16xf32> to vector<16x16xf32>
    %37 = arith.mulf %34, %36 : vector<16x16xf32>
    %38 = arith.addf %33, %37 : vector<16x16xf32>
    %c2_43 = arith.constant 2 : index
    %c1_44 = arith.constant 1 : index
    %39 = vector.load %arg7[%c2_43, %c1_44] : memref<18x18xf32, #tpu.memory_space<vmem>>, vector<16x16xf32>
    %c0_45 = arith.constant 0 : index
    %c7 = arith.constant 7 : index
    %c0_46 = arith.constant 0 : index
    %c0_47 = arith.constant 0 : index
    %40 = vector.load %arg3[%c0_45, %c7, %c0_46, %c0_47] : memref<1x9x16x16xf32, #tpu.memory_space<vmem>>, vector<1x1x16x16xf32>
    %41 = vector.shape_cast %40 : vector<1x1x16x16xf32> to vector<16x16xf32>
    %42 = arith.mulf %39, %41 : vector<16x16xf32>
    %43 = arith.addf %38, %42 : vector<16x16xf32>
    %c2_48 = arith.constant 2 : index
    %c2_49 = arith.constant 2 : index
    %44 = vector.load %arg7[%c2_48, %c2_49] : memref<18x18xf32, #tpu.memory_space<vmem>>, vector<16x16xf32>
    %c0_50 = arith.constant 0 : index
    %c8 = arith.constant 8 : index
    %c0_51 = arith.constant 0 : index
    %c0_52 = arith.constant 0 : index
    %45 = vector.load %arg3[%c0_50, %c8, %c0_51, %c0_52] : memref<1x9x16x16xf32, #tpu.memory_space<vmem>>, vector<1x1x16x16xf32>
    %46 = vector.shape_cast %45 : vector<1x1x16x16xf32> to vector<16x16xf32>
    %47 = arith.mulf %44, %46 : vector<16x16xf32>
    %48 = arith.addf %43, %47 : vector<16x16xf32>
    %49 = arith.truncf %48 : vector<16x16xf32> to vector<16x16xbf16>
    %c0_53 = arith.constant 0 : index
    %c0_54 = arith.constant 0 : index
    %c0_55 = arith.constant 0 : index
    %c0_56 = arith.constant 0 : index
    %50 = vector.load %arg4[%c0_53, %c0_54, %c0_55, %c0_56] : memref<1x1x16x16xbf16, #tpu.memory_space<vmem>>, vector<1x1x16x16xbf16>
    %51 = vector.shape_cast %50 : vector<1x1x16x16xbf16> to vector<16x16xbf16>
    %52 = vector.shape_cast %49 : vector<16x16xbf16> to vector<1x1x16x16xbf16>
    tpu.vector_store %arg4[%c0_53, %c0_54, %c0_55, %c0_56], %52 {strides = array<i32>} : memref<1x1x16x16xbf16, #tpu.memory_space<vmem>>, vector<1x1x16x16xbf16>,
    %cst_57 = arith.constant dense<0.000000e+00> : vector<16xf32>
    %53 = vector.multi_reduction <add>, %48, %cst_57 [1] : vector<16x16xf32> to vector<16xf32>
    %54 = vector.shape_cast %53 : vector<16xf32> to vector<16x1xf32>
    %55 = arith.mulf %48, %48 : vector<16x16xf32>
    %cst_58 = arith.constant dense<0.000000e+00> : vector<16xf32>
    %56 = vector.multi_reduction <add>, %55, %cst_58 [1] : vector<16x16xf32> to vector<16xf32>
    %57 = vector.shape_cast %56 : vector<16xf32> to vector<16x1xf32>
    %cst_59 = arith.constant dense<0.000000e+00> : vector<1xf32>
    %58 = vector.multi_reduction <add>, %54, %cst_59 [0] : vector<16x1xf32> to vector<1xf32>
    %59 = vector.shape_cast %58 : vector<1xf32> to vector<1x1xf32>
    %c0_60 = arith.constant 0 : index
    %c0_61 = arith.constant 0 : index
    %c0_62 = arith.constant 0 : index
    %c0_63 = arith.constant 0 : index
    %60 = vector.load %arg5[%c0_60, %c0_61, %c0_62, %c0_63] : memref<1x1x1x1xf32, #tpu.memory_space<vmem>>, vector<1x1x1x1xf32>
    %61 = vector.shape_cast %60 : vector<1x1x1x1xf32> to vector<1x1xf32>
    %62 = vector.shape_cast %59 : vector<1x1xf32> to vector<1x1x1x1xf32>
    tpu.vector_store %arg5[%c0_60, %c0_61, %c0_62, %c0_63], %62 {strides = array<i32>} : memref<1x1x1x1xf32, #tpu.memory_space<vmem>>, vector<1x1x1x1xf32>,
    %cst_64 = arith.constant dense<0.000000e+00> : vector<1xf32>
    %63 = vector.multi_reduction <add>, %57, %cst_64 [0] : vector<16x1xf32> to vector<1xf32>
    %64 = vector.shape_cast %63 : vector<1xf32> to vector<1x1xf32>
    %c0_65 = arith.constant 0 : index
    %c0_66 = arith.constant 0 : index
    %c0_67 = arith.constant 0 : index
    %c0_68 = arith.constant 0 : index
    %65 = vector.load %arg6[%c0_65, %c0_66, %c0_67, %c0_68] : memref<1x1x1x1xf32, #tpu.memory_space<vmem>>, vector<1x1x1x1xf32>
    %66 = vector.shape_cast %65 : vector<1x1x1x1xf32> to vector<1x1xf32>
    %67 = vector.shape_cast %64 : vector<1x1xf32> to vector<1x1x1x1xf32>
    tpu.vector_store %arg6[%c0_65, %c0_66, %c0_67, %c0_68], %67 {strides = array<i32>} : memref<1x1x1x1xf32, #tpu.memory_space<vmem>>, vector<1x1x1x1xf32>,
    return
  }
  func.func @transform_0(%arg0: i32, %arg1: i32) -> (i32, i32, i32, i32) {
    %c0_i32 = arith.constant 0 : i32
    %c0_i32_0 = arith.constant 0 : i32
    %c0_i32_1 = arith.constant 0 : i32
    return %arg0, %arg1, %c0_i32, %c0_i32_0 : i32, i32, i32, i32
  }
  func.func @transform_1(%arg0: i32, %arg1: i32) -> (i32, i32, i32, i32) {
    %c0_i32 = arith.constant 0 : i32
    %c0_i32_0 = arith.constant 0 : i32
    %c0_i32_1 = arith.constant 0 : i32
    return %arg0, %arg1, %c0_i32, %c0_i32_0 : i32, i32, i32, i32
  }
  func.func @transform_2(%arg0: i32, %arg1: i32) -> (i32, i32, i32, i32) {
    %c0_i32 = arith.constant 0 : i32
    %c0_i32_0 = arith.constant 0 : i32
    %c0_i32_1 = arith.constant 0 : i32
    return %arg0, %arg1, %c0_i32, %c0_i32_0 : i32, i32, i32, i32
  }
  func.func @transform_3(%arg0: i32, %arg1: i32) -> (i32, i32, i32, i32) {
    %c0_i32 = arith.constant 0 : i32
    %c0_i32_0 = arith.constant 0 : i32
    %c0_i32_1 = arith.constant 0 : i32
    return %arg0, %arg1, %c0_i32, %c0_i32_0 : i32, i32, i32, i32
  }
  func.func @transform_4(%arg0: i32, %arg1: i32) -> (i32, i32, i32, i32) {
    %c0_i32 = arith.constant 0 : i32
    %c0_i32_0 = arith.constant 0 : i32
    %c0_i32_1 = arith.constant 0 : i32
    return %arg0, %arg1, %c0_i32, %c0_i32_0 : i32, i32, i32, i32
  }
}

module attributes {stable_mosaic.version = 11 : i64} {
  func.func @_affine_relu_kernel(%arg0: i32, %arg1: i32, %arg2: memref<8x128xbf16, #tpu.memory_space<vmem>>, %arg3: memref<8x1xf32, #tpu.memory_space<vmem>>, %arg4: memref<8x1xf32, #tpu.memory_space<vmem>>, %arg5: memref<8x128xf32, #tpu.memory_space<vmem>>) attributes {dimension_semantics = [#tpu.dimension_semantics<parallel>, #tpu.dimension_semantics<parallel>], iteration_bounds = array<i64: 1, 2>, scalar_prefetch = 0 : i64, scratch_operands = 0 : i64, tpu.core_type = #tpu.core_type<tc>, window_params = [{transform_indices = @transform_0, window_bounds = array<i64: 8, 128>}, {transform_indices = @transform_1, window_bounds = array<i64: 8, 1>}, {transform_indices = @transform_2, window_bounds = array<i64: 8, 1>}, {transform_indices = @transform_3, window_bounds = array<i64: 8, 128>}]} {
    %c0 = arith.constant 0 : index
    %c0_0 = arith.constant 0 : index
    %0 = vector.load %arg2[%c0, %c0_0] : memref<8x128xbf16, #tpu.memory_space<vmem>>, vector<8x128xbf16>
    %1 = arith.extf %0 : vector<8x128xbf16> to vector<8x128xf32>
    %c0_1 = arith.constant 0 : index
    %c0_2 = arith.constant 0 : index
    %2 = vector.load %arg3[%c0_1, %c0_2] : memref<8x1xf32, #tpu.memory_space<vmem>>, vector<8x1xf32>
    %3 = vector.broadcast %2 : vector<8x1xf32> to vector<8x128xf32>
    %4 = arith.mulf %1, %3 : vector<8x128xf32>
    %c0_3 = arith.constant 0 : index
    %c0_4 = arith.constant 0 : index
    %5 = vector.load %arg4[%c0_3, %c0_4] : memref<8x1xf32, #tpu.memory_space<vmem>>, vector<8x1xf32>
    %6 = vector.broadcast %5 : vector<8x1xf32> to vector<8x128xf32>
    %7 = arith.addf %4, %6 : vector<8x128xf32>
    %cst = arith.constant 0.000000e+00 : f32
    %8 = vector.broadcast %cst : f32 to vector<8x128xf32>
    %9 = arith.maximumf %7, %8 : vector<8x128xf32>
    %c0_5 = arith.constant 0 : index
    %c0_6 = arith.constant 0 : index
    %10 = vector.load %arg5[%c0_5, %c0_6] : memref<8x128xf32, #tpu.memory_space<vmem>>, vector<8x128xf32>
    tpu.vector_store %arg5[%c0_5, %c0_6], %9 {strides = array<i32>} : memref<8x128xf32, #tpu.memory_space<vmem>>, vector<8x128xf32>,
    return
  }
  func.func @transform_0(%arg0: i32, %arg1: i32) -> (i32, i32) {
    %c0_i32 = arith.constant 0 : i32
    return %arg0, %arg1 : i32, i32
  }
  func.func @transform_1(%arg0: i32, %arg1: i32) -> (i32, i32) {
    %c0_i32 = arith.constant 0 : i32
    %c0_i32_0 = arith.constant 0 : i32
    return %arg0, %c0_i32 : i32, i32
  }
  func.func @transform_2(%arg0: i32, %arg1: i32) -> (i32, i32) {
    %c0_i32 = arith.constant 0 : i32
    %c0_i32_0 = arith.constant 0 : i32
    return %arg0, %c0_i32 : i32, i32
  }
  func.func @transform_3(%arg0: i32, %arg1: i32) -> (i32, i32) {
    %c0_i32 = arith.constant 0 : i32
    return %arg0, %arg1 : i32, i32
  }
}

</mosaic_0001>

<bundles_post_ra>
// kernel: tile.18
= control target key start
LH: loop header
LB: loop body
LE: loop exit
PB: predicated region body
PF: predicated region fallthrough
CT: control target
= control target key end

     0   :  { %s22_s0 = inlined_call_operand.vmem [shape: f32[4], index: 0, kind: input, shape index: {}]   ;;  %s23_s1 = inlined_call_operand.vmem [shape: f32[2,4], index: 1, kind: output, shape index: {}]  }
   0x1   :  { %v4_v0 = vld [vmem:[%s22_s0] ss:$0 sm:$0xff] }
   0x2   :  { %5 = vst [vmem:[%s23_s1] sm:$0x3] %v4_v0 }

// kernel: tile.0
= control target key start
LH: loop header
LB: loop body
LE: loop exit
PB: predicated region body
PF: predicated region fallthrough
CT: control target
= control target key end

     0   :  { %s34_s8 = smov 125   ;;  %s35_s9 = smov 126   ;;  %vm7_vm0 = vcmask 7168   ;;  %s61_s0 = inlined_call_operand.vmem [shape: f32[2,4], index: 0, kind: input, shape index: {}]   ;;  %s62_s1 = inlined_call_operand.vmem [shape: f32[8,1], index: 1, kind: output, shape index: {}]  }
   0x1   :  { %v4_v0 = vld [vmem:[%s61_s0] sm:$0x3]  ;;  %s33_s0 = smov 127  }
   0x2   :  { %5 = vst [vmem:[#allocation0] sm:$0x3] %v4_v0 }
   0x9   :  { %v9_v1 = vld [vmem:[#allocation0] sm:$0x3]  }
   0xa   :  { %v21_v2 = vld [vmem:[#allocation0] sm:$0x3]   ;;  %10 = vrot.lane.b32.xlu0 %v9_v1, %s33_s0 }
   0xb   :  { %22 = vrot.lane.b32.xlu1 %v21_v2, %s34_s8  ;;  %v15_v3 = vld [vmem:[#allocation0] sm:$0x3]  }
   0xc   :  { %v6_v4 = vld [vmem:[#allocation0] sm:$0x3]  }
   0xd   :  { %8 = vst.msk [vmem:[%s62_s1] ss:$4 sm:$0x3] %vm7_vm0, %v6_v4  }
  0x12   :  { %16 = vrot.lane.b32.xlu0 %v15_v3, %s35_s9 }
  0x7c   :  { %v11_v5 = vpop.permute.xlu0 %10  }
  0x7d   :  { %v23_v6 = vpop.permute.xlu1 %22   ;;  %27 = vst.msk [vmem:[%s62_s1 + $0x1] ss:$4 sm:$0x3] %vm7_vm0, %v11_v5  }
  0x7e   :  { %29 = vst.msk [vmem:[%s62_s1 + $0x3] ss:$4 sm:$0x3] %vm7_vm0, %v23_v6  }
  0x84   :  { %v17_v7 = vpop.permute.xlu0 %16  }
  0x85   :  { %28 = vst.msk [vmem:[%s62_s1 + $0x2] ss:$4 sm:$0x3] %vm7_vm0, %v17_v7  }

// kernel: basic2d_local_forward.3
= control target key start
LH: loop header
LB: loop body
LE: loop exit
PB: predicated region body
PF: predicated region fallthrough
CT: control target
= control target key end

     0   :  { %s450_s12 = smov 0   ;;  %s452_s13 = smov 0   ;;  %s486_s0 = inlined_call_operand.vmem [shape: bf16[8,256], index: 0, kind: input, shape index: {}]   ;;  %s487_s1 = inlined_call_operand.vmem [shape: f32[8,1], index: 1, kind: input, shape index: {}]   ;;  %s488_s2 = inlined_call_operand.vmem [shape: f32[8,1], index: 2, kind: input, shape index: {}]   ;;  %s489_s3 = inlined_call_operand.vmem [shape: f32[8,256], index: 3, kind: output, shape index: {}]  }
   0x1   :  { %s454_s14 = smov 0  }
   0x2 LB: > { %s22_s15 = sadd.s32 1, %s423_s13  ;;  %p374_p0 = scmp.ge.s32.totalorder %s427_s14, 1  ;;  %s427_s14 = sphi %s454_s14, %s13_s14   ;;  %s423_s13 = sphi %s452_s13, %s491_s13   ;;  %s419_s12 = sphi %s450_s12, %s490_s12  }
   0x3   : > { %p23_p1 = scmp.ge.s32.totalorder %s22_s15, 2  ;;  %p174_p2 = scmp.lt.s32.totalorder %s427_s14, 3 }
   0x5   : > { %s493_s15 = smov (%p23_p1, %s22_s15), 0  ;;  %p175_p3 = pnand %p374_p0, %p174_p2 }
   0x6   : > { %p214_p4 = scmp.lt.s32.totalorder (!%p175_p3), %s419_s12, 1 }
   0x7   : > { %178 = sbr.rel (%p175_p3) target bundleno = 142 (0x8e), region = 32 }
   0xc   : > { %v238_v0 = vld [vmem:[%s487_s1] sm:$0xff]  ;;  %v429_v1 = vmov 0   ;;  %s495_s12 = smov (!%p214_p4, %s419_s12), 1 }
   0xd   : > { %404 = vset.pattern.permute.xlu0 %v429_v1  ;;  %v245_v2 = vld [vmem:[%s488_s2] sm:$0xff]  ;;  %s375_s20 = sshll.u32 %s495_s12, 2  ;;  %s376_s24 = sshll.u32 %s495_s12, 3 }
   0xe   : > { %241 = vperm.xlu0 %404, %v238_v0   ;;  %s219_s23 = scalar_lea.vmem %s486_s0, %s375_s20  ;;  %s235_s27 = scalar_lea.vmem %s489_s3, %s376_s24 }
   0xf   : > { %v236_v4 = vld [vmem:[%s219_s23] sm:$0xf] }
  0x10   : > { %v237_v5 = vunpack.c.l.bf16 %v236_v4 }
  0x16   : > { %248 = vperm.xlu0 %404, %v245_v2  }
  0x80   : > { %v242_v3 = vpop.permute.xlu0 %241 }
  0x81   : > { %v244_v6 = vmul.f32 %v242_v3, %v237_v5 }
  0x88   : > { %v249_v7 = vpop.permute.xlu0 %248 }
  0x89   : > { %v251_v8 = vadd.f32 %v249_v7, %v244_v6 }
  0x8b   : > { %v252_v9 = vmax.f32 %v251_v8, 0.0 }
  0x8d   : > { %253 = vst [vmem:[%s235_s27] sm:$0xff] %v252_v9 }
  0x8e PF: > { %s13_s14 = sadd.s32 1, %s427_s14   ;;  %s490_s12 = smov %s423_s13 }
  0x8f   : > { %p10_p5 = scmp.ge.s32.totalorder %s13_s14, 4   ;;  %s491_s13 = smov %s493_s15 }
  0x91   :  { %12 = sbr.rel (!%p10_p5) target bundleno = 2 (0x2), region = 68 }

// kernel: basic2d_local_forward.2
= control target key start
LH: loop header
LB: loop body
LE: loop exit
PB: predicated region body
PF: predicated region fallthrough
CT: control target
= control target key end

     0   :  { %s874_s15 = smov 0   ;;  %s876_s16 = smov 0   ;;  %s977_s0 = inlined_call_operand.vmem [shape: f32[2,4,16,16], index: 0, kind: input, shape index: {}]   ;;  %s978_s1 = inlined_call_operand.vmem [shape: f32[2,36,16,16], index: 1, kind: input, shape index: {}]   ;;  %s979_s2 = inlined_call_operand.vmem [shape: bf16[2,4,16,16], index: 2, kind: output, shape index: {0}]   ;;  %s980_s3 = inlined_call_operand.vmem [shape: f32[2,4,1,1], index: 3, kind: output, shape index: {1}]   ;;  %s981_s4 = inlined_call_operand.vmem [shape: f32[2,4,1,1], index: 4, kind: output, shape index: {2}]  }
   0x1   :  { %s878_s17 = smov 0   ;;  %s880_s18 = smov 0  }
   0x2   :  { %s882_s19 = smov 0  }
   0x3 LB: > { %s24_s20 = sadd.s32 1, %s834_s17  ;;  %s27_s21 = sadd.s32 1, %s838_s18  ;;  %s842_s19 = sphi %s882_s19, %s15_s19   ;;  %s838_s18 = sphi %s880_s18, %s985_s18   ;;  %s834_s17 = sphi %s878_s17, %s984_s17   ;;  %s830_s16 = sphi %s876_s16, %s983_s16   ;;  %s826_s15 = sphi %s874_s15, %s982_s15  }
   0x4   : > { %p25_p0 = scmp.ge.s32.totalorder %s24_s20, 4  ;;  %p729_p1 = scmp.ge.s32.totalorder %s842_s19, 1 }
   0x5   : > { %p209_p2 = scmp.lt.s32.totalorder %s842_s19, 9 }
   0x6   : > { %s987_s20 = smov (%p25_p0, %s24_s20), 0  ;;  %s989_s21 = smov (!%p25_p0, %s27_s21), %s838_s18 }
   0x7   : > { %p210_p3 = pnand %p729_p1, %p209_p2  ;;  %p29_p4 = scmp.ge.s32.totalorder %s989_s21, 2 }
   0x8   : > { %p267_p5 = scmp.lt.s32.totalorder (!%p210_p3), %s830_s16, 1  ;;  %p269_p6 = scmp.lt.s32.totalorder (!%p210_p3), %s826_s15, 3 }
   0x9   : > { %s991_s21 = smov (%p29_p4, %s989_s21), 0  ;;  %213 = sbr.rel (%p210_p3) target bundleno = 434 (0x1b2), region = 28 }
   0xa   : > { %s276_s22 = smul.u32 (!%p210_p3), 9, %s826_s15  ;;  %s844_s7 = smov (!%p210_p3), 1  }
   0xb   : > { %s845_s14 = smov (!%p210_p3), 2  }
   0xc   : > { %p279_p7 = scmp.lt.s32.totalorder (!%p210_p3), %s276_s22, 35 }
   0xe   : > { %s993_s16 = smov (!%p267_p5, %s830_s16), 1  ;;  %s995_s15 = smov (!%p269_p6, %s826_s15), 3  ;;  %vm310_vm0 = vcmask 146432   ;;  %v846_v14 = vmov 0.0   ;;  %vm313_vm1 = vcmask 140288   ;;  %vm325_vm2 = vcmask 138248  }
   0xf   : > { %s731_s23 = sshll.u32 %s993_s16, 3  ;;  %s730_s24 = sshll.u32 %s995_s15, 1  ;;  %311 = vst.msk [vmem:[#allocation2] sm:$0xff] %vm310_vm0, %v846_v14  ;;  %vm495_vm3 = vcmask 130048   ;;  %vm492_vm4 = vcmask 125952   ;;  %vm517_vm5 = vcmask 0  }
  0x10   : > { %s909_s25 = sadd.s32 %s731_s23, %s730_s24  ;;  %s738_s27 = sshll.u32 %s993_s16, 2  ;;  %312 = vst.msk [vmem:[#allocation2 + $0x8] sm:$0xff] %vm310_vm0, %v846_v14 }
  0x11   : > { %s732_s26 = sshll.u32 %s909_s25, 3  ;;  %s758_s5 = smul.u32 72, %s993_s16  ;;  %314 = vst.msk [vmem:[#allocation2 + $0x10] sm:$0x3] %vm313_vm1, %v846_v14 }
  0x12   : > { %s275_s30 = scalar_lea.vmem %s977_s0, %s732_s26  ;;  %s997_s22 = smov (!%p279_p7, %s276_s22), 35 }
  0x13   : > { %v315_v0 = vld [vmem:[%s275_s30] sm:$0xff]  ;;  %s915_s6 = sadd.s32 %s738_s27, %s995_s15  ;;  %s733_s8 = sshll.u32 %s997_s22, 1  ;;  %v316_v2 = vld [vmem:[%s275_s30 + $0x8] sm:$0xff] }
  0x14   : > { %319 = vrot.lane.b32.xlu0 %v315_v0, %s844_s7  ;;  %s283_s9 = sadd.s32 %s758_s5, %s733_s8  ;;  %s847_s15 = smov 126  }
  0x15   : > { %s734_s10 = sshll.u32 %s283_s9, 3  ;;  %s848_s16 = smov 127  }
  0x16   : > { %s920_s13 = scalar_lea.vmem %s978_s1, %s734_s10  ;;  %s737_s22 = sshll.u32 %s909_s25, 2 }
  0x17   : > { %v740_v1 = vld [vmem:[%s920_s13 + $0x10] sm:$0xff]  ;;  %v742_v3 = vld [vmem:[%s920_s13 + $0x20] sm:$0xff]  ;;  %v741_v4 = vld [vmem:[%s920_s13 + $0x18] sm:$0xff]  ;;  %s295_s26 = scalar_lea.vmem %s979_s2, %s737_s22  ;;  %s302_s28 = scalar_lea.vmem %s980_s3, %s915_s6 }
  0x18   : > { %339 = vrot.lane.b32.xlu1 %v740_v1, %s844_s7  ;;  %362 = vrot.lane.b32.xlu2 %v742_v3, %s845_s14  ;;  %v743_v5 = vld [vmem:[%s920_s13 + $0x28] sm:$0xff]  ;;  %v746_v6 = vld [vmem:[%s920_s13 + $0x40] sm:$0xff]  ;;  %s309_s5 = scalar_lea.vmem %s981_s4, %s915_s6 }
  0x19   : > { %v747_v7 = vld [vmem:[%s920_s13 + $0x48] sm:$0xff]  ;;  %v748_v8 = vld [vmem:[%s920_s13 + $0x50] sm:$0xff]  ;;  %v749_v9 = vld [vmem:[%s920_s13 + $0x58] sm:$0xff] }
  0x1a   : > { %v752_v10 = vld [vmem:[%s920_s13 + $0x70] sm:$0xff]  ;;  %v753_v11 = vld [vmem:[%s920_s13 + $0x78] sm:$0xff]  ;;  %v754_v12 = vld [vmem:[%s920_s13 + $0x80] sm:$0xff] }
  0x1b   : > { %v755_v13 = vld [vmem:[%s920_s13 + $0x88] sm:$0xff]  ;;  %v330_v47 = vld [vmem:[%s920_s13] sm:$0xff]  ;;  %v744_v50 = vld [vmem:[%s920_s13 + $0x30] sm:$0xff] }
  0x1c   : > { %321 = vrot.lane.b32.xlu0 %v316_v2, %s844_s7  ;;  %v331_v56 = vld [vmem:[%s920_s13 + $0x8] sm:$0xff]  ;;  %v745_v60 = vld [vmem:[%s920_s13 + $0x38] sm:$0xff]  ;;  %v750_v3 = vld [vmem:[%s920_s13 + $0x60] sm:$0xff] }
  0x20   : > { %341 = vrot.lane.b32.xlu1 %v741_v4, %s844_s7  ;;  %364 = vrot.lane.b32.xlu2 %v743_v5, %s845_s14 }
  0x24   : > { %394 = vrot.lane.b32.xlu0 %v746_v6, %s844_s7 }
  0x28   : > { %396 = vrot.lane.b32.xlu1 %v747_v7, %s844_s7  ;;  %417 = vrot.lane.b32.xlu2 %v748_v8, %s845_s14 }
  0x2c   : > { %419 = vrot.lane.b32.xlu0 %v749_v9, %s845_s14 }
  0x30   : > { %449 = vrot.lane.b32.xlu1 %v752_v10, %s844_s7  ;;  %451 = vrot.lane.b32.xlu2 %v753_v11, %s844_s7  ;;  %v751_v10 = vld [vmem:[%s920_s13 + $0x68] sm:$0xff] }
  0x34   : > { %472 = vrot.lane.b32.xlu0 %v754_v12, %s845_s14 }
  0x38   : > { %474 = vrot.lane.b32.xlu1 %v755_v13, %s845_s14 }
  0x72   : > { %v363_v15 = vpop.permute.xlu2 %362 }
  0x7a   : > { %v365_v22 = vpop.permute.xlu2 %364 }
  0x82   : > { %v418_v28 = vpop.permute.xlu2 %417 }
  0x86   : > { %v320_v16 = vpop.permute.xlu0 %319 }
  0x87   : > { %326 = vst.msk [vmem:[#allocation2 + $0x1] sm:$0xff] %vm325_vm2, %v320_v16 }
  0x8a   : > { %v340_v17 = vpop.permute.xlu1 %339  ;;  %v452_v36 = vpop.permute.xlu2 %451 }
  0x8e   : > { %v328_v18 = vld [vmem:[#allocation2] sm:$0xff]  ;;  %v322_v19 = vpop.permute.xlu0 %321 }
  0x8f   : > { %v345_v20 = vmul.f32 %v340_v17, %v328_v18  ;;  %327 = vst.msk [vmem:[#allocation2 + $0x9] sm:$0xff] %vm325_vm2, %v322_v19  ;;  %v368_v21 = vmul.f32 %v363_v15, %v328_v18  ;;  %v380_v29 = vld [vmem:[#allocation2 + $0x1] sm:$0xff]  ;;  %v332_v49 = vmul.f32 %v330_v47, %v328_v18 }
  0x90   : > { %v423_v33 = vmul.f32 %v418_v28, %v380_v29  ;;  %v385_v54 = vmul.f32 %v744_v50, %v380_v29 }
  0x91   : > { %372 = vrot.lane.b32.xlu1 %v368_v21, %s847_s15  ;;  %349 = vrot.lane.b32.xlu2 %v345_v20, %s848_s16 }
  0x92   : > { %v342_v23 = vpop.permute.xlu1 %341 }
  0x96   : > { %v329_v24 = vld [vmem:[#allocation2 + $0x8] sm:$0xff]  ;;  %v395_v27 = vpop.permute.xlu0 %394 }
  0x97   : > { %v346_v25 = vmul.f32 %v342_v23, %v329_v24  ;;  %v369_v26 = vmul.f32 %v365_v22, %v329_v24  ;;  %v381_v31 = vld [vmem:[#allocation2 + $0x9] sm:$0xff]  ;;  %v400_v34 = vmul.f32 %v395_v27, %v380_v29  ;;  %v333_v57 = vmul.f32 %v331_v56, %v329_v24 }
  0x98   : > { %v436_v37 = vld [vmem:[#allocation2 + $0xa] sm:$0xff]  ;;  %v435_v39 = vld [vmem:[#allocation2 + $0x2] sm:$0xff]  ;;  %v386_v63 = vmul.f32 %v745_v60, %v381_v31 }
  0x99   : > { %374 = vrot.lane.b32.xlu2 %v369_v26, %s847_s15  ;;  %351 = vrot.lane.b32.xlu0 %v346_v25, %s848_s16  ;;  %v456_v41 = vmul.f32 %v452_v36, %v436_v37  ;;  %v440_v7 = vmul.f32 %v750_v3, %v435_v39  ;;  %v441_v13 = vmul.f32 %v751_v10, %v436_v37 }
  0x9a   : > { %v397_v30 = vpop.permute.xlu1 %396 }
  0x9b   : > { %v401_v32 = vmul.f32 %v397_v30, %v381_v31 }
  0x9d   : > { %406 = vrot.lane.b32.xlu1 %v401_v32, %s848_s16 }
  0x9e   : > { %v420_v35 = vpop.permute.xlu0 %419 }
  0x9f   : > { %v424_v42 = vmul.f32 %v420_v35, %v381_v31 }
  0xa1   : > { %427 = vrot.lane.b32.xlu2 %v423_v33, %s847_s15  ;;  %404 = vrot.lane.b32.xlu0 %v400_v34, %s848_s16 }
  0xa2   : > { %v450_v38 = vpop.permute.xlu1 %449 }
  0xa3   : > { %v455_v40 = vmul.f32 %v450_v38, %v435_v39 }
  0xa5   : > { %459 = vrot.lane.b32.xlu1 %v455_v40, %s848_s16 }
  0xa6   : > { %v473_v43 = vpop.permute.xlu0 %472 }
  0xa7   : > { %v478_v46 = vmul.f32 %v473_v43, %v435_v39 }
  0xa9   : > { %461 = vrot.lane.b32.xlu2 %v456_v41, %s848_s16  ;;  %429 = vrot.lane.b32.xlu0 %v424_v42, %s847_s15 }
  0xaa   : > { %v475_v44 = vpop.permute.xlu1 %474 }
  0xab   : > { %v479_v45 = vmul.f32 %v475_v44, %v436_v37 }
  0xad   : > { %484 = vrot.lane.b32.xlu1 %v479_v45, %s847_s15 }
  0xb1   : > { %482 = vrot.lane.b32.xlu0 %v478_v46, %s847_s15 }
  0xeb   : > { %v350_v48 = vpop.permute.xlu2 %349 }
  0xec   : > { %v355_v51 = vadd.f32 %v350_v48, %v332_v49 }
  0xf3   : > { %v375_v58 = vpop.permute.xlu2 %374 }
  0xfb   : > { %v428_v5 = vpop.permute.xlu2 %427 }
 0x103   : > { %v373_v52 = vpop.permute.xlu1 %372  ;;  %v462_v16 = vpop.permute.xlu2 %461 }
 0x104   : > { %v378_v53 = vadd.f32 %v373_v52, %v355_v51 }
 0x106   : > { %v387_v55 = vadd.f32 %v385_v54, %v378_v53 }
 0x10b   : > { %v352_v59 = vpop.permute.xlu0 %351 }
 0x10c   : > { %v356_v61 = vadd.f32 %v352_v59, %v333_v57 }
 0x10e   : > { %v379_v62 = vadd.f32 %v375_v58, %v356_v61 }
 0x10f   : > { %v407_v1 = vpop.permute.xlu1 %406 }
 0x110   : > { %v388_v0 = vadd.f32 %v386_v63, %v379_v62 }
 0x112   : > { %v411_v11 = vadd.f32 %v407_v1, %v388_v0 }
 0x113   : > { %v405_v2 = vpop.permute.xlu0 %404 }
 0x114   : > { %v410_v4 = vadd.f32 %v405_v2, %v387_v55 }
 0x116   : > { %v433_v6 = vadd.f32 %v428_v5, %v410_v4 }
 0x117   : > { %v460_v9 = vpop.permute.xlu1 %459 }
 0x118   : > { %v442_v8 = vadd.f32 %v440_v7, %v433_v6 }
 0x11a   : > { %v465_v19 = vadd.f32 %v460_v9, %v442_v8 }
 0x11b   : > { %v430_v12 = vpop.permute.xlu0 %429 }
 0x11c   : > { %v434_v14 = vadd.f32 %v430_v12, %v411_v11 }
 0x11e   : > { %v443_v15 = vadd.f32 %v441_v13, %v434_v14 }
 0x11f   : > { %v485_v18 = vpop.permute.xlu1 %484 }
 0x120   : > { %v466_v17 = vadd.f32 %v462_v16, %v443_v15 }
 0x122   : > { %v489_v20 = vadd.f32 %v485_v18, %v466_v17 }
 0x123   : > { %v483_v21 = vpop.permute.xlu0 %482 }
 0x124   : > { %v491_v22 = vpack.c.bf16 %v489_v20, %v489_v20  ;;  %v488_v23 = vadd.f32 %v483_v21, %v465_v19  ;;  %v499_v24 = vsel %vm495_vm3, %v489_v20, 0.0  ;;  %v503_v29 = vmul.f32 %v489_v20, %v489_v20 }
 0x125   : > { %500 = vadd.xlane.f32.xlu0 %v499_v24 }
 0x126   : > { %494 = vst.msk [vmem:[%s295_s26 + $0x4] sm:$0xf] %vm492_vm4, %v491_v22  ;;  %v490_v25 = vpack.c.bf16 %v488_v23, %v488_v23  ;;  %v496_v26 = vsel %vm495_vm3, %v488_v23, 0.0  ;;  %v502_v27 = vmul.f32 %v488_v23, %v488_v23  ;;  %v507_v30 = vsel %vm495_vm3, %v503_v29, 0.0 }
 0x127   : > { %497 = vadd.xlane.f32.xlu2 %v496_v26 }
 0x128   : > { %493 = vst.msk [vmem:[%s295_s26] sm:$0xf] %vm492_vm4, %v490_v25  ;;  %v504_v28 = vsel %vm495_vm3, %v502_v27, 0.0 }
 0x129   : > { %505 = vadd.xlane.f32.xlu1 %v504_v28 }
 0x12f   : > { %508 = vadd.xlane.f32.xlu2 %v507_v30 }
 0x198   : > { %v501_v31 = vpop.xlane.xlu0 %500 }
 0x19a   : > { %v498_v32 = vpop.xlane.xlu2 %497 }
 0x19b   : > { %v510_v33 = vadd.f32 %v501_v31, %v498_v32 }
 0x19c   : > { %v506_v37 = vpop.xlane.xlu1 %505 }
 0x19d   : > { %v511_v34 = vrot.slane %v510_v33, 4 }
 0x19f   : > { %v512_v35 = vadd.f32 %v511_v34, %v510_v33 }
 0x1a1   : > { %v513_v36 = vrot.slane %v512_v35, 2 }
 0x1a2   : > { %v509_v38 = vpop.xlane.xlu2 %508 }
 0x1a3   : > { %v514_v39 = vadd.f32 %v513_v36, %v512_v35  ;;  %v519_v40 = vadd.f32 %v509_v38, %v506_v37 }
 0x1a5   : > { %v515_v41 = vrot.slane %v514_v39, 1  ;;  %v520_v42 = vrot.slane %v519_v40, 4 }
 0x1a7   : > { %v516_v43 = vadd.f32 %v515_v41, %v514_v39  ;;  %v521_v44 = vadd.f32 %v520_v42, %v519_v40 }
 0x1a9   : > { %518 = vst.msk [vmem:[%s302_s28] sm:$0x1] %vm517_vm5, %v516_v43  ;;  %v522_v45 = vrot.slane %v521_v44, 2 }
 0x1ab   : > { %v523_v46 = vadd.f32 %v522_v45, %v521_v44 }
 0x1ad   : > { %v524_v47 = vrot.slane %v523_v46, 1 }
 0x1af   : > { %v525_v48 = vadd.f32 %v524_v47, %v523_v46 }
 0x1b1   : > { %526 = vst.msk [vmem:[%s309_s5] sm:$0x1] %vm517_vm5, %v525_v48 }
 0x1b2 PF: > { %s15_s19 = sadd.s32 1, %s842_s19   ;;  %s982_s15 = smov %s834_s17 }
 0x1b3   : > { %p12_p8 = scmp.ge.s32.totalorder %s15_s19, 10   ;;  %s983_s16 = smov %s838_s18 }
 0x1b4   : > { %s984_s17 = smov %s987_s20  ;;  %s985_s18 = smov %s991_s21 }
 0x1b5   :  { %14 = sbr.rel (!%p12_p8) target bundleno = 3 (0x3), region = 93 }

</bundles_post_ra>
